<compile_context>
chip_gen: v7x
topology: tpu7x:2x2x1
jax: 0.10.0
libtpu: 0.0.40
codegen_flags: <defaults>
</compile_context>

<pallas_src>
import functools

import jax
import jax.numpy as jnp
from jax.experimental import pallas as pl
from jax.experimental.pallas import tpu as pltpu


def _round_up(a: int, b: int) -> int:
    return (a + b - 1) // b * b


def _sublane_multiple(itemsize: int) -> int:
    # f32 -> 8, bf16/f16 -> 16, int8/fp8 -> 32 (native sublane packing).
    return {4: 8, 2: 16, 1: 32}.get(itemsize, 8)


# ~2 MiB per input tile: measured mem-bound tiling data shows 1-4 MiB tiles
# already saturate the HBM roofline; bigger tiles only add VMEM pressure.
_PER_BUFFER_BUDGET = 2 * 1024 * 1024


def _pick_row_tile(rows: int, dim: int, itemsize: int) -> int:
    """Largest sublane-aligned row tile within the per-buffer byte budget,
    accounting for the f32 upcast temporaries the kernel creates."""
    sub = _sublane_multiple(itemsize)
    bytes_per_elem = itemsize + 4  # input buffer + in-kernel f32 temporary
    t = (_PER_BUFFER_BUDGET // max(dim * bytes_per_elem, 1)) // sub * sub
    t = max(t, sub)
    # Aim for >= ~8 grid steps when the problem allows it: with
    # dimension_semantics=("parallel",) the grid shards across v7x's two
    # TensorCores, and >= 4 steps per core keeps double-buffered prefetch
    # overlap and balances the cores. Neutral on single-TC v5e/v6e.
    if rows >= 8 * sub:
        t = min(t, max(sub, (rows // 8) // sub * sub))
    # Never tile larger than the (sublane-rounded) problem itself.
    t = min(t, _round_up(rows, sub))
    return max(t, sub)


def _vmem_limit_bytes() -> int:
    """Generation-aware scoped-VMEM limit: half of physical VMEM, <= 48 MiB."""
    capacity = 64 * 1024 * 1024  # conservative fallback (v7x per-TC VMEM)
    try:
        capacity = int(pltpu.get_tpu_info().vmem_capacity_bytes)
    except Exception:
        pass
    return min(48 * 1024 * 1024, capacity // 2)


def _rmsnorm_kernel(x_ref, g_ref, o_ref, *, eps):
    x = x_ref[...].astype(jnp.float32)           # (row_tile, dim)
    g = g_ref[...]                               # (1, dim), f32, scale folded in
    sq_sum = jnp.sum(x * x, axis=-1, keepdims=True)           # (row_tile, 1)
    # F.normalize: x / max(||x||, eps)  ==  x * rsqrt(max(||x||^2, eps^2))
    inv = jax.lax.rsqrt(jnp.maximum(sq_sum, eps * eps))        # (row_tile, 1)
    o_ref[...] = (x * inv * g).astype(o_ref.dtype)


def rmsnorm(x, g, *, row_tile=None, eps=1e-12):
    """x: (batch, seq, dim); g: (dim,). Returns same shape/dtype as x."""
    batch, seq, dim = x.shape
    scale = float(dim) ** (-0.5)

    rows = batch * seq
    x2d = x.reshape(rows, dim)
    # Fold dim**-0.5 into g once (tiny (dim,) vector; negligible wrapper cost).
    g2d = (g.astype(jnp.float32) * scale).reshape(1, dim)

    itemsize = jnp.dtype(x.dtype).itemsize
    sub = _sublane_multiple(itemsize)
    if row_tile is None:
        row_tile = _pick_row_tile(rows, dim, itemsize)
    else:
        row_tile = max(sub, _round_up(row_tile, sub))

    # No wrapper-side padding: grid covers rows with partial-block handling.
    # Reads past the end of the last block are padded (garbage rows only
    # affect themselves — rows are independent) and out-of-range output
    # writes are dropped by Pallas.
    grid = (pl.cdiv(rows, row_tile),)

    out = pl.pallas_call(
        functools.partial(_rmsnorm_kernel, eps=eps),
        out_shape=jax.ShapeDtypeStruct((rows, dim), x.dtype),
        grid_spec=pltpu.PrefetchScalarGridSpec(
            num_scalar_prefetch=0,
            grid=grid,
            in_specs=[
                pl.BlockSpec((row_tile, dim), lambda i: (i, 0)),
                pl.BlockSpec((1, dim), lambda i: (0, 0)),
            ],
            out_specs=pl.BlockSpec((row_tile, dim), lambda i: (i, 0)),
        ),
        compiler_params=pltpu.CompilerParams(
            dimension_semantics=("parallel",),
            vmem_limit_bytes=_vmem_limit_bytes(),
        ),
    )(x2d, g2d)

    return out.reshape(batch, seq, dim)


def rmsnorm_ref(x, g):
    """Pure-JAX reference mirroring the PyTorch forward."""
    dim = x.shape[-1]
    scale = dim ** (-0.5)
    xf = x.astype(jnp.float32)
    norm = jnp.maximum(
        jnp.sqrt(jnp.sum(xf * xf, axis=-1, keepdims=True)), 1e-12
    )
    return (xf / norm * scale * g.astype(jnp.float32)).astype(x.dtype)


if __name__ == "__main__":
    key = jax.random.PRNGKey(0)
    batch, seq, dim = 2, 8, 128  # small, lane-aligned (dim multiple of 128)

    x = jax.random.normal(key, (batch, seq, dim), dtype=jnp.float32)
    # Deterministic parameter init matching nn.Parameter(torch.ones(dim)).
    g = jnp.ones((dim,), dtype=jnp.float32)

    out = rmsnorm(x, g)
    jax.block_until_ready(out)

    ref = rmsnorm_ref(x, g)
    assert out.shape == x.shape
    assert jnp.allclose(out, ref, atol=1e-5, rtol=1e-5), "mismatch vs reference"

    # Non-divisible row count exercises the partial-block (no-pad) path.
    x2 = jax.random.normal(jax.random.PRNGKey(1), (3, 5, dim), dtype=jnp.float32)
    out2 = rmsnorm(x2, g, row_tile=8)
    jax.block_until_ready(out2)
    assert jnp.allclose(out2, rmsnorm_ref(x2, g), atol=1e-5, rtol=1e-5)

    print("KERNEL_OK")
</pallas_src>

<mosaic_0001>
module attributes {stable_mosaic.version = 11 : i64} {
  func.func @_rmsnorm_kernel(%arg0: i32, %arg1: memref<16x128xf32, #tpu.memory_space<vmem>>, %arg2: memref<1x128xf32, #tpu.memory_space<vmem>>, %arg3: memref<16x128xf32, #tpu.memory_space<vmem>>) attributes {dimension_semantics = [#tpu.dimension_semantics<parallel>], iteration_bounds = array<i64: 1>, scalar_prefetch = 0 : i64, scratch_operands = 0 : i64, tpu.core_type = #tpu.core_type<tc>, window_params = [{transform_indices = @transform_0, window_bounds = array<i64: 16, 128>}, {pipeline_mode = #tpu.pipeline_mode<synchronous>, transform_indices = @transform_1, window_bounds = array<i64: 1, 128>}, {transform_indices = @transform_2, window_bounds = array<i64: 16, 128>}]} {
    %c0 = arith.constant 0 : index
    %c0_0 = arith.constant 0 : index
    %0 = vector.load %arg1[%c0, %c0_0] : memref<16x128xf32, #tpu.memory_space<vmem>>, vector<16x128xf32>
    %c0_1 = arith.constant 0 : index
    %c0_2 = arith.constant 0 : index
    %1 = vector.load %arg2[%c0_1, %c0_2] : memref<1x128xf32, #tpu.memory_space<vmem>>, vector<1x128xf32>
    %2 = arith.mulf %0, %0 : vector<16x128xf32>
    %cst = arith.constant dense<0.000000e+00> : vector<16xf32>
    %3 = vector.multi_reduction <add>, %2, %cst [1] : vector<16x128xf32> to vector<16xf32>
    %4 = vector.shape_cast %3 : vector<16xf32> to vector<16x1xf32>
    %cst_3 = arith.constant 1.000000e-24 : f32
    %5 = vector.broadcast %cst_3 : f32 to vector<16x1xf32>
    %6 = arith.maximumf %4, %5 : vector<16x1xf32>
    %7 = math.rsqrt %6 : vector<16x1xf32>
    %8 = vector.broadcast %7 : vector<16x1xf32> to vector<16x128xf32>
    %9 = arith.mulf %0, %8 : vector<16x128xf32>
    %10 = vector.broadcast %1 : vector<1x128xf32> to vector<16x128xf32>
    %11 = arith.mulf %9, %10 : vector<16x128xf32>
    %c0_4 = arith.constant 0 : index
    %c0_5 = arith.constant 0 : index
    %12 = vector.load %arg3[%c0_4, %c0_5] : memref<16x128xf32, #tpu.memory_space<vmem>>, vector<16x128xf32>
    tpu.vector_store %arg3[%c0_4, %c0_5], %11 {strides = array<i32>} : memref<16x128xf32, #tpu.memory_space<vmem>>, vector<16x128xf32>,
    return
  }
  func.func @transform_0(%arg0: i32) -> (i32, i32) {
    %c0_i32 = arith.constant 0 : i32
    %c0_i32_0 = arith.constant 0 : i32
    return %arg0, %c0_i32 : i32, i32
  }
  func.func @transform_1(%arg0: i32) -> (i32, i32) {
    %c0_i32 = arith.constant 0 : i32
    %c0_i32_0 = arith.constant 0 : i32
    %c0_i32_1 = arith.constant 0 : i32
    return %c0_i32, %c0_i32_0 : i32, i32
  }
  func.func @transform_2(%arg0: i32) -> (i32, i32) {
    %c0_i32 = arith.constant 0 : i32
    %c0_i32_0 = arith.constant 0 : i32
    return %arg0, %c0_i32 : i32, i32
  }
}

</mosaic_0001>

<bundles_post_ra>
// kernel: tpu_custom_call.1
= control target key start
LH: loop header
LB: loop body
LE: loop exit
PB: predicated region body
PF: predicated region fallthrough
CT: control target
= control target key end

     0   :  { %7 = vsyncpa [#allocation3], 0  ;;  %s177_s0 = inlined_call_operand.hbm [shape: f32[16,128], index: 0, kind: input, shape index: {}]   ;;  %s178_s1 = inlined_call_operand.vmem [shape: f32[1,128], index: 1, kind: input, shape index: {}]   ;;  %s179_s2 = inlined_call_operand.hbm [shape: f32[16,128], index: 2, kind: output, shape index: {}]  }
   0x1   :  { %8 = vsyncpa [#allocation4], 0  ;;  %s125_s9 = smov [#allocation2]   ;;  %s77_s13 = scalar_lea.hbm %s177_s0, 256 }
   0x2   :  { %s14_s10 = sshll.u32 %s125_s9, 4  ;;  %p78_p0 = scmp.ne.s32.totalorder %s177_s0, %s77_s13  ;;  %s15_s10 = int_to_ptr.vmem [resolvable:$true] %s14_s10 }
   0x3   :  { %p81_p1 = scmp.lt.u32.totalorder %s77_s13, %s177_s0 }
   0x5   :  { %p83_p2 = pnand %p81_p1, %p78_p0 }
   0x7   :  { %86 = shalt.err (!%p83_p2)
}
   0x8   :  { %s87_s18 = scalar_lea.vmem %s15_s10, 256  ;;  %p92_p4 = scmp.lt.s32.totalorder %s15_s10, %s15_s10 }
   0x9   :  { %p88_p3 = scmp.ne.s32.totalorder %s15_s10, %s87_s18  ;;  %p93_p5 = scmp.lt.s32.totalorder %s87_s18, %s87_s18 }
   0xb   :  { %p94_p6 = por %p93_p5, %p92_p4 }
   0xd   :  { %p95_p7 = pnand %p94_p6, %p88_p3 }
   0xf   :  { %98 = shalt.err (!%p95_p7)
}
  0x10   :  { %s126_s19 = smov 128   ;;  %s127_s20 = smov 8  }
  0x11   :  { %20 = dma.hbm_to_vmem [thread:$0]  %s177_s0, 256, %s15_s10, [#allocation3], %s126_s19, %s126_s19, %s127_s20  }
  0x12   :  { %121 = dma.done.wait [#allocation3], 256  }
  0x13   :  { %122 = vsyncadd [#allocation3], 4294967040  ;;  %v26_v0 = vld [vmem:[#allocation2] sm:$0xff]  ;;  %v27_v1 = vld [vmem:[#allocation2 + $0x8] sm:$0xff]  ;;  %s128_s0 = smov [#allocation5]  }
  0x14   :  { %v29_v2 = vmul.f32 %v26_v0, %v26_v0  ;;  %v30_v3 = vmul.f32 %v27_v1, %v27_v1  ;;  %v68_v9 = vld [vmem:[%s178_s1] ss:$0 sm:$0xff]  ;;  %s56_s25 = sshll.u32 %s128_s0, 4  ;;  %s57_s25 = int_to_ptr.vmem [resolvable:$true] %s56_s25 }
  0x15   :  { %s99_s26 = scalar_lea.vmem %s57_s25, 256  ;;  %p104_p9 = scmp.lt.s32.totalorder %s57_s25, %s57_s25 }
  0x16   :  { %31 = vadd.xlane.f32.xlu0 %v29_v2  ;;  %p100_p8 = scmp.ne.s32.totalorder %s57_s25, %s99_s26  ;;  %p105_p10 = scmp.lt.s32.totalorder %s99_s26, %s99_s26 }
  0x18   :  { %p106_p11 = por %p105_p10, %p104_p9 }
  0x1a   :  { %33 = vadd.xlane.f32.xlu0 %v30_v3  ;;  %p107_p12 = pnand %p106_p11, %p100_p8 }
  0xa3   :  { %v32_v4 = vpop.xlane.xlu0 %31 }
  0xa4   :  { %v35_v5 = vmax.f32 %v32_v4, 1e-24 }
  0xa6   :  { %73 = vrsqrt.f32 %v35_v5 }
  0xa7   :  { %v34_v6 = vpop.xlane.xlu0 %33 }
  0xa8   :  { %v36_v7 = vmax.f32 %v34_v6, 1e-24 }
  0xaa   :  { %75 = vrsqrt.f32 %v36_v7 }
  0xb0   :  { %v74_v8 = vpop.eup %73 }
  0xb1   :  { %v39_v10 = vmul.f32 %v74_v8, %v26_v0 }
  0xb3   :  { %v47_v11 = vmul.f32 %v68_v9, %v39_v10 }
  0xb4   :  { %v76_v12 = vpop.eup %75 }
  0xb5   :  { %v40_v13 = vmul.f32 %v76_v12, %v27_v1  ;;  %49 = vst [vmem:[#allocation5] sm:$0xff] %v47_v11 }
  0xb7   :  { %v48_v14 = vmul.f32 %v68_v9, %v40_v13 }
  0xb9   :  { %50 = vst [vmem:[#allocation5 + $0x8] sm:$0xff] %v48_v14 }
  0xba   :  { %110 = shalt.err (!%p107_p12)
}
  0xbb   :  { %s111_s1 = scalar_lea.hbm %s179_s2, 256 }
  0xbc   :  { %p112_p13 = scmp.ne.s32.totalorder %s179_s2, %s111_s1  ;;  %p115_p0 = scmp.lt.u32.totalorder %s111_s1, %s179_s2 }
  0xbe   :  { %p117_p1 = pnand %p115_p0, %p112_p13 }
  0xc0   :  { %120 = shalt.err (!%p117_p1)
}
  0xc1   :  { %62 = dma.vmem_to_hbm [thread:$0]  %s57_s25, 256, %s179_s2, [#allocation4], %s126_s19, %s126_s19, %s127_s20  }
  0xc2   :  { %123 = dma.done.wait [#allocation4], 256  }
  0xc3   :  { %124 = vsyncadd [#allocation4], 4294967040 }
  0xc4   :  { %66 = vsyncpa [#allocation3], 1 }
  0xc5   :  { %67 = vsyncpa [#allocation4], 1 }

</bundles_post_ra>
